<compile_context>
chip_gen: v7x
topology: tpu7x:2x2x1
jax: 0.10.0
libtpu: 0.0.40
codegen_flags: <defaults>
</compile_context>

<pallas_src>
import functools

import jax
import jax.numpy as jnp
import numpy as np
from jax.experimental import pallas as pl
from jax.experimental.pallas import tpu as pltpu


def _round_up(n, m):
    return ((n + m - 1) // m) * m


def _pad_cols(a, n_to):
    pad = n_to - a.shape[-1]
    if pad:
        a = jnp.pad(a, ((0, 0), (0, pad)))
    return a


def gated_transition_kernel(*refs, z_dim: int, h_dim: int, train: bool):
    if train:
        (x_ref, eps_ref, w1_ref, b1_ref, w2_ref, b2_ref,
         wlv_ref, blv_ref, out_ref) = refs
    else:
        (x_ref, w1_ref, b1_ref, w2_ref, b2_ref,
         wlv_ref, blv_ref, out_ref) = refs
        eps_ref = None

    z, h = z_dim, h_dim
    x = x_ref[...]                                          # (rows, Z)

    # dot1: all three z->* projections at once.
    # column layout of h1: [gate_hidden (H) | pm_hidden (H) | mu_lin (Z) | pad]
    h1 = (jnp.dot(x, w1_ref[...], preferred_element_type=jnp.float32)
          + b1_ref[...])
    hid = jnp.maximum(h1[:, :2 * h], 0.0)                   # relu on both hidden paths
    mu_lin = h1[:, 2 * h:2 * h + z]                         # fc_z2mu(x), no relu

    # dot2: block-diagonal weight -> [gate_logits (Z) | proposed_mean (Z) | pad]
    h2 = (jnp.dot(hid, w2_ref[...], preferred_element_type=jnp.float32)
          + b2_ref[...])
    gate = jax.nn.sigmoid(h2[:, :z])
    proposed_mean = h2[:, z:2 * z]

    # z_mu = (1 - gate) * fc_z2mu(x) + gate * proposed_mean
    z_mu = (1.0 - gate) * mu_lin + gate * proposed_mean

    # dot3: z_logvar = fc_z2logvar(relu(proposed_mean))
    z_logvar = (jnp.dot(jnp.maximum(proposed_mean, 0.0), wlv_ref[...],
                        preferred_element_type=jnp.float32)
                + blv_ref[...])

    # reparameterize
    if train:
        z_p = eps_ref[...] * jnp.exp(0.5 * z_logvar) + z_mu
    else:
        z_p = z_mu

    # lane-dense fused output slab: [z_p | z_mu | z_logvar | zero pad]
    pieces = [z_p, z_mu, z_logvar]
    pad_w = out_ref.shape[-1] - 3 * z
    if pad_w:
        pieces.append(jnp.zeros((x.shape[0], pad_w), jnp.float32))
    out_ref[...] = jnp.concatenate(pieces, axis=-1)


def gated_transition_z2z(z_q, params, eps=None, *, train=True, row_tile=512):
    B, T, Z = z_q.shape
    H = params["wg1"].shape[1]
    if train and eps is None:
        raise ValueError("eps must be provided when train=True")

    # z_q[:, t-1, :] for t in [0, T) == roll by +1 along the time axis.
    x = jnp.roll(z_q, shift=1, axis=1).reshape(B * T, Z).astype(jnp.float32)

    R = B * T
    # Row tiling: big tiles (default 512, multiple of 256), pad rows if needed.
    tile_r = min(_round_up(row_tile, 8), _round_up(R, 8))
    # Keep >= 2 grid steps when there is enough work (v7x: 2 TensorCores).
    if R > 256 and _round_up(R, tile_r) // tile_r < 2:
        tile_r = _round_up((R + 1) // 2, 8)
    R_pad = _round_up(R, tile_r)
    grid = (R_pad // tile_r,)

    if R_pad != R:
        x = jnp.pad(x, ((0, R_pad - R), (0, 0)))

    # ---- fuse weights / biases (wrapper side, tiny) ----
    # dot1 weight: (Z, 2H+Z) -> pad N to multiple of 128.
    w1 = jnp.concatenate([params["wg1"], params["wp1"], params["wmu"]], axis=1)
    b1 = jnp.concatenate([params["bg1"], params["bp1"], params["bmu"]], axis=1)
    N1 = _round_up(2 * H + Z, 128)
    w1 = _pad_cols(w1.astype(jnp.float32), N1)
    b1 = _pad_cols(b1.astype(jnp.float32), N1)

    # dot2 weight: block-diagonal (2H, 2Z) so one dot computes both h2z paths.
    zeros_hz = jnp.zeros((H, Z), jnp.float32)
    w2 = jnp.concatenate([
        jnp.concatenate([params["wg2"].astype(jnp.float32), zeros_hz], axis=1),
        jnp.concatenate([zeros_hz, params["wp2"].astype(jnp.float32)], axis=1),
    ], axis=0)                                              # (2H, 2Z)
    b2 = jnp.concatenate([params["bg2"], params["bp2"]], axis=1)
    N2 = _round_up(2 * Z, 128)
    w2 = _pad_cols(w2, N2)
    b2 = _pad_cols(b2.astype(jnp.float32), N2)

    wlv = params["wlv"].astype(jnp.float32)
    blv = params["blv"].astype(jnp.float32)

    OUT_W = _round_up(3 * Z, 128)

    row_spec = pl.BlockSpec((tile_r, Z), lambda i: (i, 0))
    out_spec = pl.BlockSpec((tile_r, OUT_W), lambda i: (i, 0))

    def rep(shape):  # replicated (whole-array) operand across the grid
        return pl.BlockSpec(shape, lambda i: (0, 0))

    in_specs = [row_spec]
    args = [x]
    if train:
        eps_flat = eps.reshape(B * T, Z).astype(jnp.float32)
        if R_pad != R:
            eps_flat = jnp.pad(eps_flat, ((0, R_pad - R), (0, 0)))
        in_specs.append(row_spec)
        args.append(eps_flat)

    in_specs += [
        rep((Z, N1)), rep((1, N1)),       # fused z->{gate_h, pm_h, mu}
        rep((2 * H, N2)), rep((1, N2)),   # fused block-diag h->{gate, pm}
        rep((Z, Z)), rep((1, Z)),         # fc_gt_z2logvar
    ]
    args += [w1, b1, w2, b2, wlv, blv]

    kernel = functools.partial(gated_transition_kernel,
                               z_dim=Z, h_dim=H, train=train)
    out = pl.pallas_call(
        kernel,
        grid=grid,
        in_specs=in_specs,
        out_specs=out_spec,
        out_shape=jax.ShapeDtypeStruct((R_pad, OUT_W), jnp.float32),
        compiler_params=pltpu.CompilerParams(
            dimension_semantics=("parallel",)),
    )(*args)

    out = out[:R]
    z_p = out[:, 0 * Z:1 * Z].reshape(B, T, Z)
    z_mu = out[:, 1 * Z:2 * Z].reshape(B, T, Z)
    z_lv = out[:, 2 * Z:3 * Z].reshape(B, T, Z)
    return z_p, z_mu, z_lv


def reference(z_q, params, eps, train=True):
    """Pure-JAX reference mirroring the PyTorch forward (dropout = identity)."""
    B, T, Z = z_q.shape
    x = jnp.roll(z_q, 1, axis=1).reshape(B * T, Z)
    e = eps.reshape(B * T, Z)
    h_gate = jnp.maximum(x @ params["wg1"] + params["bg1"], 0.0)
    gate = jax.nn.sigmoid(h_gate @ params["wg2"] + params["bg2"])
    h_pm = jnp.maximum(x @ params["wp1"] + params["bp1"], 0.0)
    pm = h_pm @ params["wp2"] + params["bp2"]
    mu_lin = x @ params["wmu"] + params["bmu"]
    z_mu = (1.0 - gate) * mu_lin + gate * pm
    z_lv = jnp.maximum(pm, 0.0) @ params["wlv"] + params["blv"]
    z_p = e * jnp.exp(0.5 * z_lv) + z_mu if train else z_mu
    return (z_p.reshape(B, T, Z), z_mu.reshape(B, T, Z), z_lv.reshape(B, T, Z))


def make_params(key, z_dim, trans_dim):
    ks = jax.random.split(key, 12)
    s = 0.1

    def w(k, shape):
        return (s * jax.random.normal(k, shape)).astype(jnp.float32)

    return {
        "wg1": w(ks[0], (z_dim, trans_dim)), "bg1": w(ks[1], (1, trans_dim)),
        "wg2": w(ks[2], (trans_dim, z_dim)), "bg2": w(ks[3], (1, z_dim)),
        "wp1": w(ks[4], (z_dim, trans_dim)), "bp1": w(ks[5], (1, trans_dim)),
        "wp2": w(ks[6], (trans_dim, z_dim)), "bp2": w(ks[7], (1, z_dim)),
        "wmu": w(ks[8], (z_dim, z_dim)),     "bmu": w(ks[9], (1, z_dim)),
        "wlv": w(ks[10], (z_dim, z_dim)),    "blv": w(ks[11], (1, z_dim)),
    }


if __name__ == "__main__":
    B, T, Z, H = 2, 8, 32, 64   # batch, time_step, z_dim, trans_dim

    key = jax.random.PRNGKey(0)
    k_params, k_zq, k_eps = jax.random.split(key, 3)

    params = make_params(k_params, Z, H)
    z_q = jax.random.normal(k_zq, (B, T, Z), dtype=jnp.float32)
    eps = jax.random.normal(k_eps, (B, T, Z), dtype=jnp.float32)

    # train mode (eps used inside the kernel)
    z_p, z_mu, z_logvar = gated_transition_z2z(z_q, params, eps, train=True)
    jax.block_until_ready((z_p, z_mu, z_logvar))
    r_p, r_mu, r_lv = reference(z_q, params, eps, train=True)
    np.testing.assert_allclose(np.asarray(z_p), np.asarray(r_p),
                               rtol=1e-5, atol=1e-5)
    np.testing.assert_allclose(np.asarray(z_mu), np.asarray(r_mu),
                               rtol=1e-5, atol=1e-5)
    np.testing.assert_allclose(np.asarray(z_logvar), np.asarray(r_lv),
                               rtol=1e-5, atol=1e-5)

    # eval mode (eps not passed to, nor DMA'd by, the kernel)
    e_p, e_mu, e_lv = gated_transition_z2z(z_q, params, train=False)
    jax.block_until_ready((e_p, e_mu, e_lv))
    s_p, s_mu, s_lv = reference(z_q, params, eps, train=False)
    np.testing.assert_allclose(np.asarray(e_p), np.asarray(s_p),
                               rtol=1e-5, atol=1e-5)
    np.testing.assert_allclose(np.asarray(e_mu), np.asarray(s_mu),
                               rtol=1e-5, atol=1e-5)
    np.testing.assert_allclose(np.asarray(e_lv), np.asarray(s_lv),
                               rtol=1e-5, atol=1e-5)

    # odd shape to exercise the row-padding path (no divisibility assert now)
    z_q2 = jax.random.normal(k_zq, (3, 5, Z), dtype=jnp.float32)
    eps2 = jax.random.normal(k_eps, (3, 5, Z), dtype=jnp.float32)
    o_p, o_mu, o_lv = gated_transition_z2z(z_q2, params, eps2, train=True)
    jax.block_until_ready((o_p, o_mu, o_lv))
    q_p, q_mu, q_lv = reference(z_q2, params, eps2, train=True)
    np.testing.assert_allclose(np.asarray(o_p), np.asarray(q_p),
                               rtol=1e-5, atol=1e-5)
    np.testing.assert_allclose(np.asarray(o_lv), np.asarray(q_lv),
                               rtol=1e-5, atol=1e-5)

    print("KERNEL_OK")
</pallas_src>

<mosaic_0001>
module attributes {stable_mosaic.version = 11 : i64} {
  func.func @gated_transition_kernel(%arg0: i32, %arg1: memref<16x32xf32, #tpu.memory_space<vmem>>, %arg2: memref<16x32xf32, #tpu.memory_space<vmem>>, %arg3: memref<32x256xf32, #tpu.memory_space<vmem>>, %arg4: memref<1x256xf32, #tpu.memory_space<vmem>>, %arg5: memref<128x128xf32, #tpu.memory_space<vmem>>, %arg6: memref<1x128xf32, #tpu.memory_space<vmem>>, %arg7: memref<32x32xf32, #tpu.memory_space<vmem>>, %arg8: memref<1x32xf32, #tpu.memory_space<vmem>>, %arg9: memref<16x128xf32, #tpu.memory_space<vmem>>) attributes {dimension_semantics = [#tpu.dimension_semantics<parallel>], iteration_bounds = array<i64: 1>, scalar_prefetch = 0 : i64, scratch_operands = 0 : i64, tpu.core_type = #tpu.core_type<tc>, window_params = [{transform_indices = @transform_0, window_bounds = array<i64: 16, 32>}, {transform_indices = @transform_1, window_bounds = array<i64: 16, 32>}, {pipeline_mode = #tpu.pipeline_mode<synchronous>, transform_indices = @transform_2, window_bounds = array<i64: 32, 256>}, {pipeline_mode = #tpu.pipeline_mode<synchronous>, transform_indices = @transform_3, window_bounds = array<i64: 1, 256>}, {pipeline_mode = #tpu.pipeline_mode<synchronous>, transform_indices = @transform_4, window_bounds = array<i64: 128, 128>}, {pipeline_mode = #tpu.pipeline_mode<synchronous>, transform_indices = @transform_5, window_bounds = array<i64: 1, 128>}, {pipeline_mode = #tpu.pipeline_mode<synchronous>, transform_indices = @transform_6, window_bounds = array<i64: 32, 32>}, {pipeline_mode = #tpu.pipeline_mode<synchronous>, transform_indices = @transform_7, window_bounds = array<i64: 1, 32>}, {transform_indices = @transform_8, window_bounds = array<i64: 16, 128>}]} {
    %c0 = arith.constant 0 : index
    %c0_0 = arith.constant 0 : index
    %0 = vector.load %arg1[%c0, %c0_0] : memref<16x32xf32, #tpu.memory_space<vmem>>, vector<16x32xf32>
    %c0_1 = arith.constant 0 : index
    %c0_2 = arith.constant 0 : index
    %1 = vector.load %arg3[%c0_1, %c0_2] : memref<32x256xf32, #tpu.memory_space<vmem>>, vector<32x256xf32>
    %cst = arith.constant dense<0.000000e+00> : vector<16x256xf32>
    %2 = tpu.matmul %0, %1, %cst {dimension_numbers = #tpu.dot_dimension_numbers<[1], [0], [0], [1], [0, 0, 1, 1], [], []>} : vector<16x32xf32>, vector<32x256xf32>, vector<16x256xf32> -> vector<16x256xf32>
    %c0_3 = arith.constant 0 : index
    %c0_4 = arith.constant 0 : index
    %3 = vector.load %arg4[%c0_3, %c0_4] : memref<1x256xf32, #tpu.memory_space<vmem>>, vector<1x256xf32>
    %4 = vector.broadcast %3 : vector<1x256xf32> to vector<16x256xf32>
    %5 = arith.addf %2, %4 : vector<16x256xf32>
    %6 = vector.extract_strided_slice %5 {offsets = [0, 0], sizes = [16, 128], strides = [1, 1]} : vector<16x256xf32> to vector<16x128xf32>
    %cst_5 = arith.constant 0.000000e+00 : f32
    %7 = vector.broadcast %cst_5 : f32 to vector<16x128xf32>
    %8 = arith.maximumf %6, %7 : vector<16x128xf32>
    %9 = vector.extract_strided_slice %5 {offsets = [0, 128], sizes = [16, 32], strides = [1, 1]} : vector<16x256xf32> to vector<16x32xf32>
    %c0_6 = arith.constant 0 : index
    %c0_7 = arith.constant 0 : index
    %10 = vector.load %arg5[%c0_6, %c0_7] : memref<128x128xf32, #tpu.memory_space<vmem>>, vector<128x128xf32>
    %cst_8 = arith.constant dense<0.000000e+00> : vector<16x128xf32>
    %11 = tpu.matmul %8, %10, %cst_8 {dimension_numbers = #tpu.dot_dimension_numbers<[1], [0], [0], [1], [0, 0, 1, 1], [], []>} : vector<16x128xf32>, vector<128x128xf32>, vector<16x128xf32> -> vector<16x128xf32>
    %c0_9 = arith.constant 0 : index
    %c0_10 = arith.constant 0 : index
    %12 = vector.load %arg6[%c0_9, %c0_10] : memref<1x128xf32, #tpu.memory_space<vmem>>, vector<1x128xf32>
    %13 = vector.broadcast %12 : vector<1x128xf32> to vector<16x128xf32>
    %14 = arith.addf %11, %13 : vector<16x128xf32>
    %15 = vector.extract_strided_slice %14 {offsets = [0, 0], sizes = [16, 32], strides = [1, 1]} : vector<16x128xf32> to vector<16x32xf32>
    %16 = arith.negf %15 : vector<16x32xf32>
    %17 = math.exp %16 : vector<16x32xf32>
    %cst_11 = arith.constant 1.000000e+00 : f32
    %18 = vector.broadcast %cst_11 : f32 to vector<16x32xf32>
    %19 = arith.addf %18, %17 : vector<16x32xf32>
    %20 = arith.divf %18, %19 : vector<16x32xf32>
    %21 = vector.extract_strided_slice %14 {offsets = [0, 32], sizes = [16, 32], strides = [1, 1]} : vector<16x128xf32> to vector<16x32xf32>
    %cst_12 = arith.constant 1.000000e+00 : f32
    %22 = vector.broadcast %cst_12 : f32 to vector<16x32xf32>
    %23 = arith.subf %22, %20 : vector<16x32xf32>
    %24 = arith.mulf %23, %9 : vector<16x32xf32>
    %25 = arith.mulf %20, %21 : vector<16x32xf32>
    %26 = arith.addf %24, %25 : vector<16x32xf32>
    %cst_13 = arith.constant 0.000000e+00 : f32
    %27 = vector.broadcast %cst_13 : f32 to vector<16x32xf32>
    %28 = arith.maximumf %21, %27 : vector<16x32xf32>
    %c0_14 = arith.constant 0 : index
    %c0_15 = arith.constant 0 : index
    %29 = vector.load %arg7[%c0_14, %c0_15] : memref<32x32xf32, #tpu.memory_space<vmem>>, vector<32x32xf32>
    %cst_16 = arith.constant dense<0.000000e+00> : vector<16x32xf32>
    %30 = tpu.matmul %28, %29, %cst_16 {dimension_numbers = #tpu.dot_dimension_numbers<[1], [0], [0], [1], [0, 0, 1, 1], [], []>} : vector<16x32xf32>, vector<32x32xf32>, vector<16x32xf32> -> vector<16x32xf32>
    %c0_17 = arith.constant 0 : index
    %c0_18 = arith.constant 0 : index
    %31 = vector.load %arg8[%c0_17, %c0_18] : memref<1x32xf32, #tpu.memory_space<vmem>>, vector<1x32xf32>
    %32 = vector.broadcast %31 : vector<1x32xf32> to vector<16x32xf32>
    %33 = arith.addf %30, %32 : vector<16x32xf32>
    %c0_19 = arith.constant 0 : index
    %c0_20 = arith.constant 0 : index
    %34 = vector.load %arg2[%c0_19, %c0_20] : memref<16x32xf32, #tpu.memory_space<vmem>>, vector<16x32xf32>
    %cst_21 = arith.constant 5.000000e-01 : f32
    %35 = vector.broadcast %cst_21 : f32 to vector<16x32xf32>
    %36 = arith.mulf %35, %33 : vector<16x32xf32>
    %37 = math.exp %36 : vector<16x32xf32>
    %38 = arith.mulf %34, %37 : vector<16x32xf32>
    %39 = arith.addf %38, %26 : vector<16x32xf32>
    %cst_22 = arith.constant 0.000000e+00 : f32
    %40 = vector.broadcast %cst_22 : f32 to vector<16x32xf32>
    %41 = tpu.concatenate %39, %26, %33, %40 in 1 : vector<16x32xf32>, vector<16x32xf32>, vector<16x32xf32>, vector<16x32xf32> -> vector<16x128xf32>
    %c0_23 = arith.constant 0 : index
    %c0_24 = arith.constant 0 : index
    %42 = vector.load %arg9[%c0_23, %c0_24] : memref<16x128xf32, #tpu.memory_space<vmem>>, vector<16x128xf32>
    tpu.vector_store %arg9[%c0_23, %c0_24], %41 {strides = array<i32>} : memref<16x128xf32, #tpu.memory_space<vmem>>, vector<16x128xf32>,
    return
  }
  func.func @transform_0(%arg0: i32) -> (i32, i32) {
    %c0_i32 = arith.constant 0 : i32
    %c0_i32_0 = arith.constant 0 : i32
    return %arg0, %c0_i32 : i32, i32
  }
  func.func @transform_1(%arg0: i32) -> (i32, i32) {
    %c0_i32 = arith.constant 0 : i32
    %c0_i32_0 = arith.constant 0 : i32
    return %arg0, %c0_i32 : i32, i32
  }
  func.func @transform_2(%arg0: i32) -> (i32, i32) {
    %c0_i32 = arith.constant 0 : i32
    %c0_i32_0 = arith.constant 0 : i32
    %c0_i32_1 = arith.constant 0 : i32
    return %c0_i32, %c0_i32_0 : i32, i32
  }
  func.func @transform_3(%arg0: i32) -> (i32, i32) {
    %c0_i32 = arith.constant 0 : i32
    %c0_i32_0 = arith.constant 0 : i32
    %c0_i32_1 = arith.constant 0 : i32
    return %c0_i32, %c0_i32_0 : i32, i32
  }
  func.func @transform_4(%arg0: i32) -> (i32, i32) {
    %c0_i32 = arith.constant 0 : i32
    %c0_i32_0 = arith.constant 0 : i32
    %c0_i32_1 = arith.constant 0 : i32
    return %c0_i32, %c0_i32_0 : i32, i32
  }
  func.func @transform_5(%arg0: i32) -> (i32, i32) {
    %c0_i32 = arith.constant 0 : i32
    %c0_i32_0 = arith.constant 0 : i32
    %c0_i32_1 = arith.constant 0 : i32
    return %c0_i32, %c0_i32_0 : i32, i32
  }
  func.func @transform_6(%arg0: i32) -> (i32, i32) {
    %c0_i32 = arith.constant 0 : i32
    %c0_i32_0 = arith.constant 0 : i32
    %c0_i32_1 = arith.constant 0 : i32
    return %c0_i32, %c0_i32_0 : i32, i32
  }
  func.func @transform_7(%arg0: i32) -> (i32, i32) {
    %c0_i32 = arith.constant 0 : i32
    %c0_i32_0 = arith.constant 0 : i32
    %c0_i32_1 = arith.constant 0 : i32
    return %c0_i32, %c0_i32_0 : i32, i32
  }
  func.func @transform_8(%arg0: i32) -> (i32, i32) {
    %c0_i32 = arith.constant 0 : i32
    %c0_i32_0 = arith.constant 0 : i32
    return %arg0, %c0_i32 : i32, i32
  }
}

</mosaic_0001>

<bundles_post_ra>
// kernel: tpu_custom_call.1
= control target key start
LH: loop header
LB: loop body
LE: loop exit
PB: predicated region body
PF: predicated region fallthrough
CT: control target
= control target key end

     0   :  { %13 = vsyncpa [#allocation3], 0  ;;  %s954_s0 = inlined_call_operand.hbm [shape: f32[16,32], index: 0, kind: input, shape index: {}]   ;;  %s955_s1 = inlined_call_operand.hbm [shape: f32[16,32], index: 1, kind: input, shape index: {}]   ;;  %s956_s2 = inlined_call_operand.hbm [shape: f32[32,256], index: 2, kind: input, shape index: {}]   ;;  %s957_s3 = inlined_call_operand.vmem [shape: f32[1,256], index: 3, kind: input, shape index: {}]   ;;  %s958_s4 = inlined_call_operand.hbm [shape: f32[128,128], index: 4, kind: input, shape index: {}]   ;;  %s959_s5 = inlined_call_operand.vmem [shape: f32[1,128], index: 5, kind: input, shape index: {}]   ;;  %s960_s6 = inlined_call_operand.hbm [shape: f32[32,32], index: 6, kind: input, shape index: {}]   ;;  %s961_s7 = inlined_call_operand.vmem [shape: f32[1,32], index: 7, kind: input, shape index: {}]   ;;  %s962_s8 = inlined_call_operand.hbm [shape: f32[16,128], index: 8, kind: output, shape index: {}]  }
   0x1   :  { %14 = vsyncpa [#allocation6], 0 }
   0x2   :  { %15 = vsyncpa [#allocation9], 0 }
   0x3   :  { %16 = vsyncpa [#allocation4], 0  ;;  %s779_s27 = smov [#allocation5]   ;;  %s780_s29 = smov [#allocation8]  }
   0x4   :  { %s34_s28 = sshll.u32 %s779_s27, 4  ;;  %s60_s30 = sshll.u32 %s780_s29, 4  ;;  %s35_s28 = int_to_ptr.vmem [resolvable:$true] %s34_s28  ;;  %s838_s30 = int_to_ptr.vmem [resolvable:$true] %s60_s30 }
   0x5   :  { %s639_s11 = scalar_lea.hbm %s955_s1, 256 }
   0x6   :  { %p640_p0 = scmp.ne.s32.totalorder %s955_s1, %s639_s11  ;;  %p643_p1 = scmp.lt.u32.totalorder %s639_s11, %s955_s1 }
   0x8   :  { %p645_p2 = pnand %p643_p1, %p640_p0 }
   0xa   :  { %648 = shalt.err (!%p645_p2)
}
   0xb   :  { %s649_s16 = scalar_lea.vmem %s35_s28, 256  ;;  %p654_p4 = scmp.lt.s32.totalorder %s35_s28, %s35_s28 }
   0xc   :  { %p650_p3 = scmp.ne.s32.totalorder %s35_s28, %s649_s16  ;;  %p655_p5 = scmp.lt.s32.totalorder %s649_s16, %s649_s16 }
   0xe   :  { %p656_p6 = por %p655_p5, %p654_p4 }
  0x10   :  { %p657_p7 = pnand %p656_p6, %p650_p3 }
  0x12   :  { %660 = shalt.err (!%p657_p7)
}
  0x13   :  { %s781_s17 = smov 128   ;;  %s782_s18 = smov 8  }
  0x14   :  { %40 = dma.hbm_to_vmem [thread:$0]  %s955_s1, 256, %s35_s28, [#allocation6], %s781_s17, %s781_s17, %s782_s18  }
  0x15   :  { %s661_s23 = scalar_lea.hbm %s958_s4, 2048 }
  0x16   :  { %p662_p8 = scmp.ne.s32.totalorder %s958_s4, %s661_s23  ;;  %p665_p9 = scmp.lt.u32.totalorder %s661_s23, %s958_s4 }
  0x18   :  { %p667_p10 = pnand %p665_p9, %p662_p8 }
  0x1a   :  { %670 = shalt.err (!%p667_p10)
}
  0x1b   :  { %s671_s29 = scalar_lea.vmem %s838_s30, 2048  ;;  %p676_p12 = scmp.lt.s32.totalorder %s838_s30, %s838_s30 }
  0x1c   :  { %p672_p11 = scmp.ne.s32.totalorder %s838_s30, %s671_s29  ;;  %p677_p13 = scmp.lt.s32.totalorder %s671_s29, %s671_s29 }
  0x1e   :  { %p678_p0 = por %p677_p13, %p676_p12 }
  0x20   :  { %p679_p1 = pnand %p678_p0, %p672_p11 }
  0x22   :  { %682 = shalt.err (!%p679_p1)
}
  0x23   :  { %66 = dma.hbm_to_vmem [thread:$0]  %s958_s4, 2048, %s838_s30, [#allocation9], %s781_s17, %s781_s17, %s782_s18  }
  0x24   :  { %s783_s9 = smov [#allocation2]   ;;  %s784_s11 = smov [#allocation7]  }
  0x25   :  { %s22_s10 = sshll.u32 %s783_s9, 4  ;;  %s46_s12 = sshll.u32 %s784_s11, 4  ;;  %s23_s10 = int_to_ptr.vmem [resolvable:$true] %s22_s10  ;;  %s875_s12 = int_to_ptr.vmem [resolvable:$true] %s46_s12 }
  0x26   :  { %s683_s15 = scalar_lea.hbm %s954_s0, 256 }
  0x27   :  { %p684_p2 = scmp.ne.s32.totalorder %s954_s0, %s683_s15  ;;  %p687_p3 = scmp.lt.u32.totalorder %s683_s15, %s954_s0 }
  0x29   :  { %p689_p4 = pnand %p687_p3, %p684_p2 }
  0x2b   :  { %692 = shalt.err (!%p689_p4)
}
  0x2c   :  { %s693_s4 = scalar_lea.vmem %s23_s10, 256  ;;  %p698_p6 = scmp.lt.s32.totalorder %s23_s10, %s23_s10 }
  0x2d   :  { %p694_p5 = scmp.ne.s32.totalorder %s23_s10, %s693_s4  ;;  %p699_p7 = scmp.lt.s32.totalorder %s693_s4, %s693_s4 }
  0x2f   :  { %p700_p8 = por %p699_p7, %p698_p6 }
  0x31   :  { %p701_p9 = pnand %p700_p8, %p694_p5 }
  0x33   :  { %704 = shalt.err (!%p701_p9)
}
  0x34   :  { %28 = dma.hbm_to_vmem [thread:$0]  %s954_s0, 256, %s23_s10, [#allocation3], %s781_s17, %s781_s17, %s782_s18  }
  0x35   :  { %s705_s25 = scalar_lea.hbm %s956_s2, 1024 }
  0x36   :  { %p706_p10 = scmp.ne.s32.totalorder %s956_s2, %s705_s25  ;;  %p709_p11 = scmp.lt.u32.totalorder %s705_s25, %s956_s2 }
  0x38   :  { %p711_p12 = pnand %p709_p11, %p706_p10 }
  0x3a   :  { %714 = shalt.err (!%p711_p12)
}
  0x3b   :  { %s715_s28 = scalar_lea.vmem %s875_s12, 1024  ;;  %p720_p0 = scmp.lt.s32.totalorder %s875_s12, %s875_s12 }
  0x3c   :  { %p716_p13 = scmp.ne.s32.totalorder %s875_s12, %s715_s28  ;;  %p721_p1 = scmp.lt.s32.totalorder %s715_s28, %s715_s28 }
  0x3e   :  { %p722_p2 = por %p721_p1, %p720_p0 }
  0x40   :  { %p723_p3 = pnand %p722_p2, %p716_p13 }
  0x42   :  { %726 = shalt.err (!%p723_p3)
}
  0x43   :  { %s785_s0 = smov 256   ;;  %s786_s9 = smov 16  }
  0x44   :  { %52 = dma.hbm_to_vmem [thread:$0]  %s956_s2, 1024, %s875_s12, [#allocation6], %s785_s0, %s785_s0, %s786_s9  }
  0x45   :  { %s787_s13 = smov [#allocation10]   ;;  %s727_s19 = scalar_lea.hbm %s960_s6, 512 }
  0x46   :  { %s74_s14 = sshll.u32 %s787_s13, 4  ;;  %p728_p4 = scmp.ne.s32.totalorder %s960_s6, %s727_s19  ;;  %s75_s14 = int_to_ptr.vmem [resolvable:$true] %s74_s14 }
  0x47   :  { %p731_p5 = scmp.lt.u32.totalorder %s727_s19, %s960_s6 }
  0x49   :  { %p733_p6 = pnand %p731_p5, %p728_p4 }
  0x4b   :  { %736 = shalt.err (!%p733_p6)
}
  0x4c   :  { %s737_s22 = scalar_lea.vmem %s75_s14, 512  ;;  %p742_p8 = scmp.lt.s32.totalorder %s75_s14, %s75_s14 }
  0x4d   :  { %p738_p7 = scmp.ne.s32.totalorder %s75_s14, %s737_s22  ;;  %p743_p9 = scmp.lt.s32.totalorder %s737_s22, %s737_s22 }
  0x4f   :  { %p744_p10 = por %p743_p9, %p742_p8 }
  0x51   :  { %p745_p11 = pnand %p744_p10, %p738_p7 }
  0x53   :  { %748 = shalt.err (!%p745_p11)
}
  0x54   :  { %80 = dma.hbm_to_vmem [thread:$0]  %s960_s6, 512, %s75_s14, [#allocation9], %s781_s17, %s781_s17, %s782_s18  }
  0x55   :  { %771 = dma.done.wait [#allocation3], 256  }
  0x56   :  { %772 = vsyncadd [#allocation3], 4294967040 }
  0x57   :  { %773 = dma.done.wait [#allocation6], 1280  }
  0x58   :  { %774 = vsyncadd [#allocation6], 4294966016 }
  0x59   :  { %775 = dma.done.wait [#allocation9], 2560  }
  0x5a   :  { %776 = vsyncadd [#allocation9], 4294964736  ;;  %v788_v0 = vmov 0.0   ;;  %v101_v1 = vld [vmem:[#allocation7 + $0x8] sm:$0xff]  ;;  %v103_v2 = vld [vmem:[#allocation7 + $0x18] sm:$0xff]  ;;  %vm120_vm0 = vcmask 261120   ;;  %v110_v33 = vlaneseq }
  0x5b   :  { %191 = vmatprep.mubr.f32.mxu0 %v788_v0  ;;  %v100_v3 = vld [vmem:[#allocation7] sm:$0xff]  ;;  %v565_v4 = vpack.c.bf16 %v103_v2, %v101_v1  ;;  %v102_v5 = vld [vmem:[#allocation7 + $0x10] sm:$0xff]  ;;  %v105_v6 = vld [vmem:[#allocation7 + $0x28] sm:$0xff]  ;;  %s789_s25 = smov 96   ;;  %s791_s29 = smov 64   ;;  %vm460_vm1 = vcmask 523264  }
  0x5c   :  { %v107_v7 = vld [vmem:[#allocation7 + $0x38] sm:$0xff]  ;;  %v567_v8 = vpack.c.bf16 %v102_v5, %v100_v3  ;;  %v104_v10 = vld [vmem:[#allocation7 + $0x20] sm:$0xff]  ;;  %v106_v11 = vld [vmem:[#allocation7 + $0x30] sm:$0xff]  ;;  %v111_v34 = vshrl.u32 %v110_v33, 7  ;;  %vm463_vm2 = vcmask 785408  }
  0x5d   :  { %v569_v9 = vpack.c.bf16 %v107_v7, %v105_v6  ;;  %566 = vmatprep.subr.bf16.mxu0 %v565_v4  ;;  %v206_v12 = vld [vmem:[#allocation8] sm:$0xff]  ;;  %v207_v13 = vld [vmem:[#allocation8 + $0x8] sm:$0xff]  ;;  %v571_v14 = vpack.c.bf16 %v106_v11, %v104_v10  ;;  %v208_v16 = vld [vmem:[#allocation8 + $0x10] sm:$0xff] }
  0x5e   :  { %568 = vmatpush1.bf16.msra.mxu0 %v567_v8  ;;  %v573_v15 = vpack.c.bf16 %v207_v13, %v206_v12  ;;  %v209_v17 = vld [vmem:[#allocation8 + $0x18] sm:$0xff]  ;;  %v210_v19 = vld [vmem:[#allocation8 + $0x20] sm:$0xff]  ;;  %v211_v20 = vld [vmem:[#allocation8 + $0x28] sm:$0xff]  ;;  %v116_v36 = vsub.s32 1, %v111_v34  ;;  %v112_v44 = vsub.s32 0, %v111_v34 }
  0x5f   :  { %570 = vmatprep.subr.bf16.mxu0 %v569_v9  ;;  %v577_v18 = vpack.c.bf16 %v209_v17, %v208_v16  ;;  %v98_v21 = vld [vmem:[#allocation2] sm:$0xff]  ;;  %v581_v22 = vpack.c.bf16 %v211_v20, %v210_v19  ;;  %v212_v23 = vld [vmem:[#allocation8 + $0x30] sm:$0xff]  ;;  %v213_v24 = vld [vmem:[#allocation8 + $0x38] sm:$0xff] }
  0x60   :  { %574 = vmatprep.subr.bf16.mxu1 %v573_v15  ;;  %v99_v25 = vld [vmem:[#allocation2 + $0x8] sm:$0xff]  ;;  %v585_v26 = vpack.c.bf16 %v213_v24, %v212_v23  ;;  %v214_v27 = vld [vmem:[#allocation8 + $0x40] sm:$0xff]  ;;  %v216_v30 = vld [vmem:[#allocation8 + $0x50] sm:$0xff] }
  0x61   :  { %576 = vmatpush3.bf16.msra.mxu1 %v573_v15  ;;  %v215_v28 = vld [vmem:[#allocation8 + $0x48] sm:$0xff]  ;;  %v217_v31 = vld [vmem:[#allocation8 + $0x58] sm:$0xff]  ;;  %v108_v35 = vld [vmem:[%s957_s3] sm:$0x3] }
  0x62   :  { %572 = vmatpush1.bf16.msra.mxu0 %v571_v14  ;;  %578 = vmatprep.subr.bf16.mxu1 %v577_v18  ;;  %v589_v29 = vpack.c.bf16 %v215_v28, %v214_v27  ;;  %v593_v32 = vpack.c.bf16 %v217_v31, %v216_v30  ;;  %v218_v37 = vld [vmem:[#allocation8 + $0x60] sm:$0xff]  ;;  %v219_v38 = vld [vmem:[#allocation8 + $0x68] sm:$0xff]  ;;  %v117_v40 = vrot.slane %v108_v35, %v116_v36  ;;  %v220_v41 = vld [vmem:[#allocation8 + $0x70] sm:$0xff] }
  0x63   :  { %v597_v39 = vpack.c.bf16 %v219_v38, %v218_v37  ;;  %v221_v42 = vld [vmem:[#allocation8 + $0x78] sm:$0xff]  ;;  %v113_v45 = vrot.slane %v108_v35, %v112_v44  ;;  %v334_v56 = vld [vmem:[#allocation10] sm:$0xff]  ;;  %v335_v57 = vld [vmem:[#allocation10 + $0x8] sm:$0xff] }
  0x64   :  { %v601_v43 = vpack.c.bf16 %v221_v42, %v220_v41  ;;  %v605_v58 = vpack.c.bf16 %v335_v57, %v334_v56  ;;  %v336_v59 = vld [vmem:[#allocation10 + $0x10] sm:$0xff]  ;;  %v337_v60 = vld [vmem:[#allocation10 + $0x18] sm:$0xff]  ;;  %v489_v62 = vld [vmem:[%s959_s5] ss:$0 sm:$0xff]  ;;  %s790_s5 = smov 32  }
  0x65   :  { %487 = vmatmul.mubr.msk.f32.vlgmr.msra.gmra.mrb[0].mxu0 %vm120_vm0, %v98_v21  ;;  %580 = vmatpush3.bf16.msra.mxu1 %v577_v18  ;;  %v609_v61 = vpack.c.bf16 %v337_v60, %v336_v59  ;;  %v431_v35 = vld [vmem:[#allocation5 + $0x8] sm:$0xff]  ;;  %v430_v37 = vld [vmem:[#allocation5] sm:$0xff] }
  0x66   :  { %197 = vmatprep.mubr.f32.mxu0 %v788_v0  ;;  %582 = vmatprep.subr.bf16.mxu1 %v581_v22 }
  0x67   :  { %606 = vmatprep.subr.bf16.mxu0 %v605_v58 }
  0x68   :  { %608 = vmatpush3.bf16.msra.mxu0 %v605_v58 }
  0x69   :  { %488 = vmatmul.mubr.msk.f32.gmra.mrb[2].mxu0 %vm120_vm0, %v99_v25  ;;  %584 = vmatpush3.bf16.msra.mxu1 %v581_v22  ;;  %v492_v25 = vld [vmem:[%s961_s7] ss:$0 sm:$0xff]  ;;  %s792_s7 = smov [#allocation11]  }
  0x6a   :  { %586 = vmatprep.subr.bf16.mxu1 %v585_v26  ;;  %610 = vmatprep.subr.bf16.mxu0 %v609_v61  ;;  %s473_s1 = sshll.u32 %s792_s7, 4  ;;  %s474_s1 = int_to_ptr.vmem [resolvable:$true] %s473_s1 }
  0x6b   :  { %s749_s28 = scalar_lea.vmem %s474_s1, 256  ;;  %p754_p13 = scmp.lt.s32.totalorder %s474_s1, %s474_s1 }
  0x6c   :  { %612 = vmatpush3.bf16.msra.mxu0 %v609_v61  ;;  %p750_p12 = scmp.ne.s32.totalorder %s474_s1, %s749_s28  ;;  %p755_p0 = scmp.lt.s32.totalorder %s749_s28, %s749_s28 }
  0x6d   :  { %588 = vmatpush3.bf16.msra.mxu1 %v585_v26 }
  0x6e   :  { %590 = vmatprep.subr.bf16.mxu1 %v589_v29  ;;  %p756_p1 = por %p755_p0, %p754_p13 }
  0x70   :  { %p757_p2 = pnand %p756_p1, %p750_p12 }
  0x71   :  { %592 = vmatpush3.bf16.msra.mxu1 %v589_v29 }
  0x72   :  { %594 = vmatprep.subr.bf16.mxu1 %v593_v32 }
  0x75   :  { %596 = vmatpush3.bf16.msra.mxu1 %v593_v32 }
  0x76   :  { %598 = vmatprep.subr.bf16.mxu1 %v597_v39 }
  0x79   :  { %600 = vmatpush3.bf16.msra.mxu1 %v597_v39 }
  0x7a   :  { %602 = vmatprep.subr.bf16.mxu1 %v601_v43 }
  0x7d   :  { %604 = vmatpush3.bf16.msra.mxu1 %v601_v43 }
 0x138   :  { %v193_v46 = vpop.f32.mrb[0].mxu0 }
 0x139   :  { %v195_v47 = vpop.f32.mrb[1].mxu0  ;;  %v194_v48 = vadd.f32 %v193_v46, %v113_v45 }
 0x13a   :  { %v196_v49 = vadd.f32 %v195_v47, %v117_v40 }
 0x13b   :  { %v204_v50 = vmax.f32 %v194_v48, 0.0 }
 0x13c   :  { %v199_v51 = vpop.f32.mrb[2].mxu0 }
 0x13d   :  { %v200_v52 = vadd.f32 %v199_v51, %v113_v45  ;;  %v201_v53 = vpop.f32.mrb[3].mxu0  ;;  %551 = vmatprep.mubr.f32.mxu1 %v204_v50 }
 0x13e   :  { %v202_v54 = vadd.f32 %v201_v53, %v117_v40 }
 0x13f   :  { %v205_v55 = vmax.f32 %v200_v52, 0.0 }
 0x141   :  { %552 = vmatmul.mubr.f32.vlgmr.msra.gmra.mrb[0].mxu1 %v205_v55 }
 0x214   :  { %v553_v63 = vpop.f32.mrb[0].mxu1 }
 0x215   :  { %v301_v0 = vadd.f32 %v553_v63, %v489_v62  ;;  %v295_v1 = vpop.f32.mrb[1].mxu1 }
 0x216   :  { %v296_v2 = vadd.f32 %v489_v62, %v295_v1 }
 0x217   :  { %v491_v3 = vmul.f32 -1.442695, %v301_v0  ;;  %v333_v6 = vmax.f32 %v301_v0, 0.0 }
 0x218   :  { %v490_v4 = vmul.f32 -1.442695, %v296_v2  ;;  %322 = vrot.lane.b32.xlu1 %v296_v2, %s789_s25  ;;  %v332_v5 = vmax.f32 %v296_v2, 0.0 }
 0x219   :  { %627 = vpow2.f32 %v491_v3 }
 0x21a   :  { %629 = vpow2.f32 %v490_v4  ;;  %347 = vrot.lane.b32.xlu0 %v332_v5, %s789_s25 }
 0x21c   :  { %324 = vrot.lane.b32.xlu1 %v301_v0, %s789_s25 }
 0x21e   :  { %349 = vrot.lane.b32.xlu0 %v333_v6, %s789_s25 }
 0x223   :  { %v628_v7 = vpop.eup %627 }
 0x224   :  { %v630_v8 = vpop.eup %629  ;;  %v311_v9 = vadd.f32 1.0, %v628_v7 }
 0x225   :  { %v310_v10 = vadd.f32 1.0, %v630_v8 }
 0x226   :  { %631 = vrcp.f32 %v311_v9 }
 0x227   :  { %633 = vrcp.f32 %v310_v10 }
 0x230   :  { %v632_v11 = vpop.eup %631 }
 0x231   :  { %v634_v12 = vpop.eup %633  ;;  %v317_v13 = vsub.f32 1.0, %v632_v11 }
 0x232   :  { %v316_v14 = vsub.f32 1.0, %v634_v12 }
 0x233   :  { %v319_v15 = vmul.f32 %v317_v13, %v202_v54 }
 0x234   :  { %v318_v16 = vmul.f32 %v316_v14, %v196_v49 }
 0x28a   :  { %v323_v17 = vpop.permute.xlu1 %322 }
 0x28b   :  { %v328_v18 = vmul.f32 %v634_v12, %v323_v17 }
 0x28c   :  { %v348_v19 = vpop.permute.xlu0 %347 }
 0x28d   :  { %v330_v20 = vadd.f32 %v328_v18, %v318_v16  ;;  %562 = vmatprep.mubr.msk.f32.mxu0 %vm120_vm0, %v348_v19 }
 0x28e   :  { %v325_v21 = vpop.permute.xlu1 %324 }
 0x28f   :  { %v329_v22 = vmul.f32 %v632_v11, %v325_v21  ;;  %444 = vrot.lane.b32.xlu0 %v330_v20, %s790_s5 }
 0x290   :  { %v350_v23 = vpop.permute.xlu0 %349 }
 0x291   :  { %v331_v24 = vadd.f32 %v329_v22, %v319_v15  ;;  %563 = vmatmul.mubr.msk.f32.vlgmr.msra.gmra.mrb[4].mxu0 %vm120_vm0, %v350_v23 }
 0x293   :  { %446 = vrot.lane.b32.xlu1 %v331_v24, %s790_s5 }
 0x301   :  { %v445_v42 = vpop.permute.xlu0 %444 }
 0x305   :  { %v447_v40 = vpop.permute.xlu1 %446 }
 0x364   :  { %v564_v26 = vpop.f32.mrb[4].mxu0 }
 0x365   :  { %v427_v27 = vadd.f32 %v564_v26, %v492_v25  ;;  %v421_v28 = vpop.f32.mrb[5].mxu0 }
 0x366   :  { %v422_v29 = vadd.f32 %v492_v25, %v421_v28 }
 0x367   :  { %454 = vrot.lane.b32.xlu1 %v427_v27, %s791_s29  ;;  %v433_v30 = vmul.f32 0.5, %v427_v27 }
 0x368   :  { %452 = vrot.lane.b32.xlu0 %v422_v29, %s791_s29  ;;  %v432_v31 = vmul.f32 0.5, %v422_v29 }
 0x369   :  { %v436_v32 = vmul.f32 1.442695, %v433_v30 }
 0x36a   :  { %v434_v33 = vmul.f32 1.442695, %v432_v31 }
 0x36b   :  { %635 = vpow2.f32 %v436_v32 }
 0x36c   :  { %637 = vpow2.f32 %v434_v33 }
 0x375   :  { %v636_v34 = vpop.eup %635 }
 0x376   :  { %v638_v36 = vpop.eup %637  ;;  %v439_v38 = vmul.f32 %v636_v34, %v431_v35 }
 0x377   :  { %v438_v39 = vmul.f32 %v638_v36, %v430_v37 }
 0x378   :  { %v441_v41 = vadd.f32 %v439_v38, %v331_v24 }
 0x379   :  { %v440_v43 = vadd.f32 %v438_v39, %v330_v20 }
 0x37a   :  { %v459_v45 = vsel %vm120_vm0, %v441_v41, %v447_v40 }
 0x37b   :  { %v458_v48 = vsel %vm120_vm0, %v440_v43, %v445_v42 }
 0x3d9   :  { %v455_v44 = vpop.permute.xlu1 %454 }
 0x3da   :  { %v462_v46 = vsel %vm460_vm1, %v459_v45, %v455_v44  ;;  %v453_v47 = vpop.permute.xlu0 %452 }
 0x3db   :  { %v465_v49 = vsel %vm463_vm2, %v462_v46, 0.0  ;;  %v461_v50 = vsel %vm460_vm1, %v458_v48, %v453_v47 }
 0x3dc   :  { %467 = vst [vmem:[#allocation11 + $0x8] sm:$0xff] %v465_v49  ;;  %v464_v51 = vsel %vm463_vm2, %v461_v50, 0.0 }
 0x3dd   :  { %466 = vst [vmem:[#allocation11] sm:$0xff] %v464_v51 }
 0x3de   :  { %760 = shalt.err (!%p757_p2)
}
 0x3df   :  { %s761_s10 = scalar_lea.hbm %s962_s8, 256 }
 0x3e0   :  { %p762_p3 = scmp.ne.s32.totalorder %s962_s8, %s761_s10  ;;  %p765_p4 = scmp.lt.u32.totalorder %s761_s10, %s962_s8 }
 0x3e2   :  { %p767_p5 = pnand %p765_p4, %p762_p3 }
 0x3e4   :  { %770 = shalt.err (!%p767_p5)
}
 0x3e5   :  { %479 = dma.vmem_to_hbm [thread:$0]  %s474_s1, 256, %s962_s8, [#allocation4], %s781_s17, %s781_s17, %s782_s18  }
 0x3e6   :  { %777 = dma.done.wait [#allocation4], 256  }
 0x3e7   :  { %778 = vsyncadd [#allocation4], 4294967040 }
 0x3e8   :  { %483 = vsyncpa [#allocation3], 1 }
 0x3e9   :  { %484 = vsyncpa [#allocation6], 1 }
 0x3ea   :  { %485 = vsyncpa [#allocation9], 1 }
 0x3eb   :  { %486 = vsyncpa [#allocation4], 1 }

</bundles_post_ra>
